<compile_context>
chip_gen: v5e
topology: v5e:2x2
jax: 0.10.0
libtpu: 0.0.40
codegen_flags: <defaults>
</compile_context>

<pallas_src>
import numpy as np
import jax
import jax.numpy as jnp
from jax.experimental import pallas as pl
from jax.experimental.pallas import tpu as pltpu


def _round_up(x, m):
    return ((x + m - 1) // m) * m


# ---------------------------------------------------------------------------
# Pass A: per-point MLP (conv1/2/3 + folded BN + ReLU) and global max-pool.
# grid = (B, n_tiles); the (1,1,1024) output block is resident across the tile
# axis and accumulates a running max.
# ---------------------------------------------------------------------------
def _make_global_feature_kernel(n_points, tile, needs_mask):
    def kernel(x_ref, a1_ref, c1_ref, a2_ref, c2_ref, a3_ref, c3_ref, g_ref):
        t = pl.program_id(1)

        @pl.when(t == 0)
        def _init():
            g_ref[...] = jnp.full_like(g_ref, -jnp.inf)

        x = x_ref[0].astype(jnp.bfloat16)                              # (tile, 3)
        h1 = jnp.maximum(
            jnp.dot(x, a1_ref[...], preferred_element_type=jnp.float32)
            + c1_ref[...], 0.0)                                        # (tile, 64)
        h2 = jnp.maximum(
            jnp.dot(h1.astype(jnp.bfloat16), a2_ref[...],
                    preferred_element_type=jnp.float32)
            + c2_ref[...], 0.0)                                        # (tile, 128)
        h3 = jnp.maximum(
            jnp.dot(h2.astype(jnp.bfloat16), a3_ref[...],
                    preferred_element_type=jnp.float32)
            + c3_ref[...], 0.0)                                        # (tile, 1024)

        if needs_mask:
            rows = t * tile + jax.lax.broadcasted_iota(jnp.int32, (tile, 1), 0)
            h3 = jnp.where(rows < n_points, h3, -jnp.inf)

        g_ref[0] = jnp.maximum(g_ref[0], jnp.max(h3, axis=0, keepdims=True))

    return kernel


# ---------------------------------------------------------------------------
# Pass B: fc1 over concat([local(64), global(1024)]) as a split matmul
# (global part hoisted to a once-per-batch matvec), fc2, final max over points.
# ---------------------------------------------------------------------------
def _make_fc_kernel(n_points, tile, needs_mask):
    def kernel(x_ref, g_ref, a1_ref, c1_ref, a4a_ref, a4b_ref, c4_ref,
               a5_ref, c5_ref, out_ref, bias_ref):
        t = pl.program_id(1)

        @pl.when(t == 0)
        def _init():
            # bias_eff = g @ W_fc1[:, 64:]^T + b_fc1, computed once per batch
            # element (M=1 matvec) and reused for every point tile.
            bias_ref[...] = (
                jnp.dot(g_ref[0].astype(jnp.bfloat16), a4b_ref[...],
                        preferred_element_type=jnp.float32)
                + c4_ref[...])
            out_ref[...] = jnp.full_like(out_ref, -jnp.inf)

        x = x_ref[0].astype(jnp.bfloat16)                              # (tile, 3)
        h1 = jnp.maximum(                                              # local feat
            jnp.dot(x, a1_ref[...], preferred_element_type=jnp.float32)
            + c1_ref[...], 0.0)                                        # (tile, 64)
        f1 = jnp.maximum(
            jnp.dot(h1.astype(jnp.bfloat16), a4a_ref[...],
                    preferred_element_type=jnp.float32)
            + bias_ref[...], 0.0)                                      # (tile, 1024)
        f2 = jnp.maximum(
            jnp.dot(f1.astype(jnp.bfloat16), a5_ref[...],
                    preferred_element_type=jnp.float32)
            + c5_ref[...], 0.0)                                        # (tile, 512)

        if needs_mask:
            rows = t * tile + jax.lax.broadcasted_iota(jnp.int32, (tile, 1), 0)
            f2 = jnp.where(rows < n_points, f2, -jnp.inf)

        out_ref[0] = jnp.maximum(out_ref[0], jnp.max(f2, axis=0, keepdims=True))

    return kernel


def encoder_forward(x, folded, *, tile=256):
    """x: (B, N, 3) float32; folded: tuple from fold_params. -> (B, 1, 512)."""
    B, N, C = x.shape
    assert C == 3
    (a1, c1, a2, c2, a3, c3, a4a, a4b, c4, a5, c5) = folded

    tile = _round_up(min(tile, _round_up(N, 8)), 8)
    n_pad = _round_up(N, tile)
    n_tiles = n_pad // tile
    needs_mask = n_pad != N
    if needs_mask:
        x = jnp.pad(x, ((0, 0), (0, n_pad - N), (0, 0)))

    def wspec(arr):
        # Weights / biases: one block = whole array, constant index map.
        return pl.BlockSpec(arr.shape, lambda b, t: (0,) * arr.ndim)

    x_spec = pl.BlockSpec((1, tile, 3), lambda b, t: (b, t, 0))

    compiler_params = pltpu.CompilerParams(
        dimension_semantics=("parallel", "arbitrary"),
        vmem_limit_bytes=32 * 1024 * 1024)

    def nbytes(*arrs):
        return int(sum(a.size * a.dtype.itemsize for a in arrs))

    # ----- pass A: global feature -------------------------------------------
    flops_a = 2 * B * n_pad * (3 * 64 + 64 * 128 + 128 * 1024)
    cost_a = pl.CostEstimate(
        flops=flops_a, transcendentals=0,
        bytes_accessed=nbytes(x, a1, c1, a2, c2, a3, c3) + B * 1024 * 4)

    g = pl.pallas_call(
        _make_global_feature_kernel(N, tile, needs_mask),
        out_shape=jax.ShapeDtypeStruct((B, 1, 1024), jnp.float32),
        grid=(B, n_tiles),
        in_specs=[x_spec, wspec(a1), wspec(c1), wspec(a2), wspec(c2),
                  wspec(a3), wspec(c3)],
        out_specs=pl.BlockSpec((1, 1, 1024), lambda b, t: (b, 0, 0)),
        compiler_params=compiler_params,
        cost_estimate=cost_a,
    )(x, a1, c1, a2, c2, a3, c3)

    # ----- pass B: fc1/fc2 + final max ---------------------------------------
    flops_b = (2 * B * n_pad * (3 * 64 + 64 * 1024 + 1024 * 512)
               + 2 * B * 1024 * 1024)
    cost_b = pl.CostEstimate(
        flops=flops_b, transcendentals=0,
        bytes_accessed=nbytes(x, g, a1, c1, a4a, a4b, c4, a5, c5) + B * 512 * 4)

    out = pl.pallas_call(
        _make_fc_kernel(N, tile, needs_mask),
        out_shape=jax.ShapeDtypeStruct((B, 1, 512), jnp.float32),
        grid=(B, n_tiles),
        in_specs=[x_spec,
                  pl.BlockSpec((1, 1, 1024), lambda b, t: (b, 0, 0)),
                  wspec(a1), wspec(c1), wspec(a4a), wspec(a4b), wspec(c4),
                  wspec(a5), wspec(c5)],
        out_specs=pl.BlockSpec((1, 1, 512), lambda b, t: (b, 0, 0)),
        scratch_shapes=[pltpu.VMEM((1, 1024), jnp.float32)],
        compiler_params=compiler_params,
        cost_estimate=cost_b,
    )(x, g, a1, c1, a4a, a4b, c4, a5, c5)
    return out


# ---------------------------------------------------------------------------
# Deterministic parameter construction (same shapes as the PyTorch module)
# ---------------------------------------------------------------------------
def make_raw_params(key):
    ks = jax.random.split(key, 22)

    def rnd(k, shape, scale=0.1):
        return scale * jax.random.normal(k, shape, dtype=jnp.float32)

    # Conv1d(kernel=1) weights stored as (out, in); Linear as (out, in).
    w1, b1 = rnd(ks[0], (64, 3)),     rnd(ks[1], (64,))
    w2, b2 = rnd(ks[2], (128, 64)),   rnd(ks[3], (128,))
    w3, b3 = rnd(ks[4], (1024, 128)), rnd(ks[5], (1024,))
    wfc1, bfc1 = rnd(ks[6], (1024, 1088)), rnd(ks[7], (1024,))
    wfc2, bfc2 = rnd(ks[8], (512, 1024)),  rnd(ks[9], (512,))

    def bn(kg, kb, km, kv, c):
        gamma = 1.0 + 0.1 * jax.random.normal(kg, (c,), jnp.float32)
        beta = 0.1 * jax.random.normal(kb, (c,), jnp.float32)
        mean = 0.1 * jax.random.normal(km, (c,), jnp.float32)
        var = 0.5 + jnp.abs(jax.random.normal(kv, (c,), jnp.float32))
        return gamma, beta, mean, var

    g1, be1, m1, v1 = bn(ks[10], ks[11], ks[12], ks[13], 64)
    g2, be2, m2, v2 = bn(ks[14], ks[15], ks[16], ks[17], 128)
    g3, be3, m3, v3 = bn(ks[18], ks[19], ks[20], ks[21], 1024)

    return dict(w1=w1, b1=b1, g1=g1, be1=be1, m1=m1, v1=v1,
                w2=w2, b2=b2, g2=g2, be2=be2, m2=m2, v2=v2,
                w3=w3, b3=b3, g3=g3, be3=be3, m3=m3, v3=v3,
                wfc1=wfc1, bfc1=bfc1, wfc2=wfc2, bfc2=bfc2)


def fold_params(p, eps=1e-5):
    """Fold conv bias + BN (eval) into (in, out) bf16 weights + (1, out) f32 bias."""
    def fold(w, b, g, be, m, v):
        s = g / jnp.sqrt(v + eps)                       # (out,)
        a = (w * s[:, None]).T                          # (in, out)
        c = ((b - m) * s + be)[None, :]                 # (1, out)
        return a.astype(jnp.bfloat16), c.astype(jnp.float32)

    a1, c1 = fold(p["w1"], p["b1"], p["g1"], p["be1"], p["m1"], p["v1"])
    a2, c2 = fold(p["w2"], p["b2"], p["g2"], p["be2"], p["m2"], p["v2"])
    a3, c3 = fold(p["w3"], p["b3"], p["g3"], p["be3"], p["m3"], p["v3"])

    # fc1: split (1024, 1088) into local (first 64 inputs) and global (last 1024).
    a4a = p["wfc1"][:, :64].T.astype(jnp.bfloat16)      # (64, 1024)
    a4b = p["wfc1"][:, 64:].T.astype(jnp.bfloat16)      # (1024, 1024)
    c4 = p["bfc1"][None, :].astype(jnp.float32)         # (1, 1024)

    a5 = p["wfc2"].T.astype(jnp.bfloat16)               # (1024, 512)
    c5 = p["bfc2"][None, :].astype(jnp.float32)         # (1, 512)

    return (a1, c1, a2, c2, a3, c3, a4a, a4b, c4, a5, c5)


def reference_forward(x, p, eps=1e-5):
    """Pure-JAX (f32) mirror of the PyTorch forward (NCL conventions)."""
    xt = jnp.transpose(x, (0, 2, 1))                    # (B, 3, N)

    def conv_bn_relu(z, w, b, g, be, m, v):
        y = jnp.einsum('oc,bcn->bon', w, z) + b[None, :, None]
        y = g[None, :, None] * (y - m[None, :, None]) / \
            jnp.sqrt(v[None, :, None] + eps) + be[None, :, None]
        return jnp.maximum(y, 0.0)

    h1 = conv_bn_relu(xt, p["w1"], p["b1"], p["g1"], p["be1"], p["m1"], p["v1"])
    h2 = conv_bn_relu(h1, p["w2"], p["b2"], p["g2"], p["be2"], p["m2"], p["v2"])
    h3 = conv_bn_relu(h2, p["w3"], p["b3"], p["g3"], p["be3"], p["m3"], p["v3"])

    gmax = jnp.max(h3, axis=2, keepdims=True)                       # (B, 1024, 1)
    gfeat = jnp.broadcast_to(gmax, (x.shape[0], 1024, x.shape[1]))  # (B, 1024, N)
    feat = jnp.concatenate([h1, gfeat], axis=1)                     # (B, 1088, N)
    ft = jnp.transpose(feat, (0, 2, 1))                             # (B, N, 1088)

    f1 = jnp.maximum(ft @ p["wfc1"].T + p["bfc1"], 0.0)             # (B, N, 1024)
    f2 = jnp.maximum(f1 @ p["wfc2"].T + p["bfc2"], 0.0)             # (B, N, 512)
    return jnp.max(f2, axis=1, keepdims=True)                       # (B, 1, 512)


if __name__ == "__main__":
    key = jax.random.PRNGKey(0)
    kx, kp, kx2 = jax.random.split(key, 3)

    raw = make_raw_params(kp)
    folded = fold_params(raw)

    # Small shape consistent with the module: batch=2, num_points=16.
    B, N = 2, 16
    x = jax.random.normal(kx, (B, N, 3), dtype=jnp.float32)
    out = jax.block_until_ready(encoder_forward(x, folded))
    assert out.shape == (B, 1, 512), out.shape
    ref = jax.block_until_ready(reference_forward(x, raw))
    # bf16 GEMM operands (f32 accumulate) -> slightly relaxed tolerance.
    np.testing.assert_allclose(np.asarray(out), np.asarray(ref),
                               rtol=2e-2, atol=2e-2)

    # Second case exercising the multi-tile + ragged-tail masking path.
    B2, N2 = 2, 300
    x2 = jax.random.normal(kx2, (B2, N2, 3), dtype=jnp.float32)
    out2 = jax.block_until_ready(encoder_forward(x2, folded))
    ref2 = jax.block_until_ready(reference_forward(x2, raw))
    np.testing.assert_allclose(np.asarray(out2), np.asarray(ref2),
                               rtol=2e-2, atol=2e-2)

    print("KERNEL_OK")
</pallas_src>

<mosaic_0001>
module attributes {stable_mosaic.version = 11 : i64} {
  func.func @kernel(%arg0: i32, %arg1: i32, %arg2: memref<1x16x3xf32, #tpu.memory_space<vmem>>, %arg3: memref<3x64xbf16, #tpu.memory_space<vmem>>, %arg4: memref<1x64xf32, #tpu.memory_space<vmem>>, %arg5: memref<64x128xbf16, #tpu.memory_space<vmem>>, %arg6: memref<1x128xf32, #tpu.memory_space<vmem>>, %arg7: memref<128x1024xbf16, #tpu.memory_space<vmem>>, %arg8: memref<1x1024xf32, #tpu.memory_space<vmem>>, %arg9: memref<1x1x1024xf32, #tpu.memory_space<vmem>>) attributes {dimension_semantics = [#tpu.dimension_semantics<parallel>, #tpu.dimension_semantics<arbitrary>], iteration_bounds = array<i64: 2, 1>, scalar_prefetch = 0 : i64, scratch_operands = 0 : i64, tpu.core_type = #tpu.core_type<tc>, window_params = [{transform_indices = @transform_0, window_bounds = array<i64: 1, 16, 3>}, {pipeline_mode = #tpu.pipeline_mode<synchronous>, transform_indices = @transform_1, window_bounds = array<i64: 3, 64>}, {pipeline_mode = #tpu.pipeline_mode<synchronous>, transform_indices = @transform_2, window_bounds = array<i64: 1, 64>}, {pipeline_mode = #tpu.pipeline_mode<synchronous>, transform_indices = @transform_3, window_bounds = array<i64: 64, 128>}, {pipeline_mode = #tpu.pipeline_mode<synchronous>, transform_indices = @transform_4, window_bounds = array<i64: 1, 128>}, {pipeline_mode = #tpu.pipeline_mode<synchronous>, transform_indices = @transform_5, window_bounds = array<i64: 128, 1024>}, {pipeline_mode = #tpu.pipeline_mode<synchronous>, transform_indices = @transform_6, window_bounds = array<i64: 1, 1024>}, {transform_indices = @transform_7, window_bounds = array<i64: 1, 1, 1024>}]} {
    %c0_i32 = arith.constant 0 : i32
    %0 = arith.cmpi eq, %arg1, %c0_i32 : i32
    %1 = arith.extui %0 : i1 to i32
    %c0_i32_0 = arith.constant 0 : i32
    %2 = arith.cmpi ne, %1, %c0_i32_0 : i32
    scf.if %2 {
      %cst_27 = arith.constant 0xFF800000 : f32
      %37 = vector.broadcast %cst_27 : f32 to vector<1x1x1024xf32>
      %c0_28 = arith.constant 0 : index
      %c0_29 = arith.constant 0 : index
      %c0_30 = arith.constant 0 : index
      %38 = vector.load %arg9[%c0_28, %c0_29, %c0_30] : memref<1x1x1024xf32, #tpu.memory_space<vmem>>, vector<1x1x1024xf32>
      tpu.vector_store %arg9[%c0_28, %c0_29, %c0_30], %37 {strides = array<i32>} : memref<1x1x1024xf32, #tpu.memory_space<vmem>>, vector<1x1x1024xf32>,
    } else {
    }
    %c0 = arith.constant 0 : index
    %c0_1 = arith.constant 0 : index
    %c0_2 = arith.constant 0 : index
    %3 = vector.load %arg2[%c0, %c0_1, %c0_2] : memref<1x16x3xf32, #tpu.memory_space<vmem>>, vector<1x16x3xf32>
    %4 = vector.shape_cast %3 : vector<1x16x3xf32> to vector<16x3xf32>
    %5 = arith.truncf %4 : vector<16x3xf32> to vector<16x3xbf16>
    %c0_3 = arith.constant 0 : index
    %c0_4 = arith.constant 0 : index
    %6 = vector.load %arg3[%c0_3, %c0_4] : memref<3x64xbf16, #tpu.memory_space<vmem>>, vector<3x64xbf16>
    %cst = arith.constant dense<0.000000e+00> : vector<16x64xf32>
    %7 = tpu.matmul %5, %6, %cst {dimension_numbers = #tpu.dot_dimension_numbers<[1], [0], [0], [1], [0, 0, 1, 1], [], []>} : vector<16x3xbf16>, vector<3x64xbf16>, vector<16x64xf32> -> vector<16x64xf32>
    %c0_5 = arith.constant 0 : index
    %c0_6 = arith.constant 0 : index
    %8 = vector.load %arg4[%c0_5, %c0_6] : memref<1x64xf32, #tpu.memory_space<vmem>>, vector<1x64xf32>
    %9 = vector.broadcast %8 : vector<1x64xf32> to vector<16x64xf32>
    %10 = arith.addf %7, %9 : vector<16x64xf32>
    %cst_7 = arith.constant 0.000000e+00 : f32
    %11 = vector.broadcast %cst_7 : f32 to vector<16x64xf32>
    %12 = arith.maximumf %10, %11 : vector<16x64xf32>
    %13 = arith.truncf %12 : vector<16x64xf32> to vector<16x64xbf16>
    %c0_8 = arith.constant 0 : index
    %c0_9 = arith.constant 0 : index
    %14 = vector.load %arg5[%c0_8, %c0_9] : memref<64x128xbf16, #tpu.memory_space<vmem>>, vector<64x128xbf16>
    %cst_10 = arith.constant dense<0.000000e+00> : vector<16x128xf32>
    %15 = tpu.matmul %13, %14, %cst_10 {dimension_numbers = #tpu.dot_dimension_numbers<[1], [0], [0], [1], [0, 0, 1, 1], [], []>} : vector<16x64xbf16>, vector<64x128xbf16>, vector<16x128xf32> -> vector<16x128xf32>
    %c0_11 = arith.constant 0 : index
    %c0_12 = arith.constant 0 : index
    %16 = vector.load %arg6[%c0_11, %c0_12] : memref<1x128xf32, #tpu.memory_space<vmem>>, vector<1x128xf32>
    %17 = vector.broadcast %16 : vector<1x128xf32> to vector<16x128xf32>
    %18 = arith.addf %15, %17 : vector<16x128xf32>
    %cst_13 = arith.constant 0.000000e+00 : f32
    %19 = vector.broadcast %cst_13 : f32 to vector<16x128xf32>
    %20 = arith.maximumf %18, %19 : vector<16x128xf32>
    %21 = arith.truncf %20 : vector<16x128xf32> to vector<16x128xbf16>
    %c0_14 = arith.constant 0 : index
    %c0_15 = arith.constant 0 : index
    %22 = vector.load %arg7[%c0_14, %c0_15] : memref<128x1024xbf16, #tpu.memory_space<vmem>>, vector<128x1024xbf16>
    %cst_16 = arith.constant dense<0.000000e+00> : vector<16x1024xf32>
    %23 = tpu.matmul %21, %22, %cst_16 {dimension_numbers = #tpu.dot_dimension_numbers<[1], [0], [0], [1], [0, 0, 1, 1], [], []>} : vector<16x128xbf16>, vector<128x1024xbf16>, vector<16x1024xf32> -> vector<16x1024xf32>
    %c0_17 = arith.constant 0 : index
    %c0_18 = arith.constant 0 : index
    %24 = vector.load %arg8[%c0_17, %c0_18] : memref<1x1024xf32, #tpu.memory_space<vmem>>, vector<1x1024xf32>
    %25 = vector.broadcast %24 : vector<1x1024xf32> to vector<16x1024xf32>
    %26 = arith.addf %23, %25 : vector<16x1024xf32>
    %cst_19 = arith.constant 0.000000e+00 : f32
    %27 = vector.broadcast %cst_19 : f32 to vector<16x1024xf32>
    %28 = arith.maximumf %26, %27 : vector<16x1024xf32>
    %c0_20 = arith.constant 0 : index
    %c0_21 = arith.constant 0 : index
    %c0_22 = arith.constant 0 : index
    %29 = vector.load %arg9[%c0_20, %c0_21, %c0_22] : memref<1x1x1024xf32, #tpu.memory_space<vmem>>, vector<1x1x1024xf32>
    %30 = vector.shape_cast %29 : vector<1x1x1024xf32> to vector<1x1024xf32>
    %cst_23 = arith.constant dense<0xFF800000> : vector<1024xf32>
    %31 = vector.multi_reduction <maximumf>, %28, %cst_23 [0] : vector<16x1024xf32> to vector<1024xf32>
    %32 = vector.shape_cast %31 : vector<1024xf32> to vector<1x1024xf32>
    %33 = arith.maximumf %30, %32 : vector<1x1024xf32>
    %c0_24 = arith.constant 0 : index
    %c0_25 = arith.constant 0 : index
    %c0_26 = arith.constant 0 : index
    %34 = vector.load %arg9[%c0_24, %c0_25, %c0_26] : memref<1x1x1024xf32, #tpu.memory_space<vmem>>, vector<1x1x1024xf32>
    %35 = vector.shape_cast %34 : vector<1x1x1024xf32> to vector<1x1024xf32>
    %36 = vector.shape_cast %33 : vector<1x1024xf32> to vector<1x1x1024xf32>
    tpu.vector_store %arg9[%c0_24, %c0_25, %c0_26], %36 {strides = array<i32>} : memref<1x1x1024xf32, #tpu.memory_space<vmem>>, vector<1x1x1024xf32>,
    return
  }
  func.func @transform_0(%arg0: i32, %arg1: i32) -> (i32, i32, i32) {
    %c0_i32 = arith.constant 0 : i32
    %c0_i32_0 = arith.constant 0 : i32
    return %arg0, %arg1, %c0_i32 : i32, i32, i32
  }
  func.func @transform_1(%arg0: i32, %arg1: i32) -> (i32, i32) {
    %c0_i32 = arith.constant 0 : i32
    %c0_i32_0 = arith.constant 0 : i32
    %c0_i32_1 = arith.constant 0 : i32
    return %c0_i32, %c0_i32_0 : i32, i32
  }
  func.func @transform_2(%arg0: i32, %arg1: i32) -> (i32, i32) {
    %c0_i32 = arith.constant 0 : i32
    %c0_i32_0 = arith.constant 0 : i32
    %c0_i32_1 = arith.constant 0 : i32
    return %c0_i32, %c0_i32_0 : i32, i32
  }
  func.func @transform_3(%arg0: i32, %arg1: i32) -> (i32, i32) {
    %c0_i32 = arith.constant 0 : i32
    %c0_i32_0 = arith.constant 0 : i32
    %c0_i32_1 = arith.constant 0 : i32
    return %c0_i32, %c0_i32_0 : i32, i32
  }
  func.func @transform_4(%arg0: i32, %arg1: i32) -> (i32, i32) {
    %c0_i32 = arith.constant 0 : i32
    %c0_i32_0 = arith.constant 0 : i32
    %c0_i32_1 = arith.constant 0 : i32
    return %c0_i32, %c0_i32_0 : i32, i32
  }
  func.func @transform_5(%arg0: i32, %arg1: i32) -> (i32, i32) {
    %c0_i32 = arith.constant 0 : i32
    %c0_i32_0 = arith.constant 0 : i32
    %c0_i32_1 = arith.constant 0 : i32
    return %c0_i32, %c0_i32_0 : i32, i32
  }
  func.func @transform_6(%arg0: i32, %arg1: i32) -> (i32, i32) {
    %c0_i32 = arith.constant 0 : i32
    %c0_i32_0 = arith.constant 0 : i32
    %c0_i32_1 = arith.constant 0 : i32
    return %c0_i32, %c0_i32_0 : i32, i32
  }
  func.func @transform_7(%arg0: i32, %arg1: i32) -> (i32, i32, i32) {
    %c0_i32 = arith.constant 0 : i32
    %c0_i32_0 = arith.constant 0 : i32
    %c0_i32_1 = arith.constant 0 : i32
    return %arg0, %c0_i32, %c0_i32_0 : i32, i32, i32
  }
}

</mosaic_0001>

<bundles_post_ra>
// kernel: tpu_custom_call.1
= control target key start
LH: loop header
LB: loop body
LE: loop exit
PB: predicated region body
PF: predicated region fallthrough
CT: control target
= control target key end

     0   :  { %s2041_s0 = inlined_call_operand.vmem [shape: f32[2,16,3], index: 0, kind: input, shape index: {}]   ;;  %s2042_s1 = inlined_call_operand.hbm [shape: bf16[3,64], index: 1, kind: input, shape index: {}]   ;;  %s2043_s2 = inlined_call_operand.hbm [shape: f32[1,64], index: 2, kind: input, shape index: {}]   ;;  %s2044_s3 = inlined_call_operand.vmem [shape: bf16[64,128], index: 3, kind: input, shape index: {}]   ;;  %s2045_s4 = inlined_call_operand.vmem [shape: f32[1,128], index: 4, kind: input, shape index: {}]   ;;  %s2046_s5 = inlined_call_operand.hbm [shape: bf16[128,1024], index: 5, kind: input, shape index: {}]   ;;  %s2047_s6 = inlined_call_operand.vmem [shape: f32[1,1024], index: 6, kind: input, shape index: {}]   ;;  %s2048_s7 = inlined_call_operand.hbm [shape: f32[2,1,1024], index: 7, kind: output, shape index: {}]  }
   0x1   :  { %2051 = sst [smem:[#allocation15_spill]] %s2043_s2 }
   0x2   :  { %12 = vsyncpa [#allocation3], 0 }
   0x3   :  { %13 = vsyncpa [#allocation6], 0 }
   0x4   :  { %14 = vsyncpa [#allocation4], 0 }
   0x5   :  { %16 = vsyncpa [#allocation4 + $0x1], 0  ;;  %s1864_s24 = smov 0   ;;  %s1866_s25 = smov 0  }
   0x6   :  { %s1868_s26 = smov 0   ;;  %s1870_s27 = smov 0  }
   0x7   :  { %s1872_s28 = smov 0   ;;  %s1874_s29 = smov 0  }
   0x8 LB: > { %2052 = sst [smem:[#allocation12_spill]] %s1812_s28  ;;  %s1187_s30 = sadd.s32 4294967295, %s1816_s29   ;;  %s1816_s29 = sphi %s1874_s29, %s22_s29   ;;  %s1812_s28 = sphi %s1872_s28, %s2067_s28   ;;  %s1808_s27 = sphi %s1870_s27, %s2062_s27   ;;  %s1804_s26 = sphi %s1868_s26, %s2066_s26   ;;  %s1800_s25 = sphi %s1866_s25, %s2065_s25   ;;  %s1796_s24 = sphi %s1864_s24, %s2064_s24  }
   0x9   : > { %s1188_s8 = sadd.s32 4294967294, %s1816_s29   ;;  %s34_s9 = sadd.s32 1, %s1812_s28 }
   0xa   : > { %s195_s10 = sadd.s32 1, %s1804_s26  ;;  %p36_p0 = scmp.ge.s32.totalorder %s34_s9, 2 }
   0xb   : > { %p205_p1 = scmp.ne.s32.totalorder %s1804_s26, %s1800_s25  ;;  %p206_p2 = scmp.eq.s32.totalorder %s1187_s30, 1 }
   0xc   : > { %p211_p3 = scmp.ne.s32.totalorder %s1800_s25, %s1796_s24  ;;  %s2069_s9 = smov (%p36_p0, %s34_s9), 0 }
   0xd   : > { %2053 = sst [smem:[#allocation13_spill]] %s2069_s9  ;;  %p1904_p4 = por %p206_p2, %p205_p1 }
   0xe   : > { %p212_p5 = scmp.eq.s32.totalorder %s1188_s8, 1  ;;  %s192_s12 = ssub.s32 %s1812_s28, %s2069_s9 }
   0xf   : > { %p1189_p6 = scmp.ge.s32.totalorder %s1816_s29, 1  ;;  %p193_p7 = scmp.eq.s32.totalorder %s192_s12, 0 }
  0x10   : > { %p1911_p8 = por %p212_p5, %p211_p3  ;;  %p219_p9 = scmp.lt.s32.totalorder %s1816_s29, 3 }
  0x11   : > { %s1917_s14 = scalar_select %p193_p7, %s1804_s26, %s195_s10  }
  0x12   : > { %p1919_p10 = pnand %p1189_p6, %p219_p9  ;;  %p1923_p11 = scmp.eq.s32.totalorder %s1187_s30, 0 }
  0x13   : > { %2056 = sst [smem:[#allocation14_spill]] %s1917_s14  ;;  %s1818_s20 = smov [#allocation5]  }
  0x14   : > { %s2059_s2 = sld [smem:[#allocation15_spill]]  ;;  %p1562_p12 = pneg %p1919_p10 }
  0x15   : > { %s245_s21 = sshll.u32 %s1818_s20, 4  ;;  %s231_s8 = sshll.u32 %s2042_s1, 4  ;;  %s246_s21 = int_to_ptr.vmem [resolvable:$true] %s245_s21  ;;  %s232_s8 = int_to_ptr.hbm [resolvable:$true] %s231_s8 }
  0x16   : > { %p1934_p13 = pnand %p1923_p11, %p1562_p12  ;;  %s260_s17 = sshll.u32 %s2046_s5, 4  ;;  %s261_s17 = int_to_ptr.hbm [resolvable:$true] %s260_s17 }
  0x17   : > { %s1819_s18 = smov [#allocation2]   ;;  %s1821_s28 = smov 512  }
  0x18   : > { %s233_s20 = sshll.u32 %s1819_s18, 4  ;;  %s1822_s14 = smov 32   ;;  %s234_s20 = int_to_ptr.vmem [resolvable:$true] %s233_s20 }
  0x19   : > { %1565 = dma.hbm_to_vmem [thread:$0]  (!%p1934_p13), %s232_s8, 32, %s234_s20, [#allocation3]  }
  0x1a   : > { %s243_s19 = sshll.u32 %s2059_s2, 4  ;;  %s1820_s2 = smov [#allocation7]   ;;  %s244_s19 = int_to_ptr.hbm [resolvable:$true] %s243_s19 }
  0x1b   : > { %1568 = dma.hbm_to_vmem [thread:$0]  (!%p1934_p13), %s244_s19, 16, %s246_s21, [#allocation6]  }
  0x1c   : > { %s262_s9 = sshll.u32 %s1820_s2, 4  ;;  %294 = sbr.rel (%p1919_p10) target bundleno = 507 (0x1fb), region = 48  ;;  %s263_s9 = int_to_ptr.vmem [resolvable:$true] %s262_s9 }
  0x1d   : > { %1571 = dma.hbm_to_vmem [thread:$0]  (!%p1934_p13), %s261_s17, 8192, %s263_s9, [#allocation6], %s1821_s28, %s1821_s28, %s1822_s14  }
  0x21   : > { %1783 = dma.done.wait (%p1923_p11), [#allocation3], 32  }
  0x22   : > { %1785 = vsyncadd (%p1923_p11), [#allocation3], 4294967264 }
  0x23   : > { %1787 = dma.done.wait (%p1923_p11), [#allocation6], 8208  }
  0x24   : > { %1789 = vsyncadd (%p1923_p11), [#allocation6], 4294959088  ;;  %vm369_vm0 = vcmask 1040384   ;;  %p342_p0 = scmp.lt.s32.totalorder %s1808_s27, 1  ;;  %vm370_vm1 = vcmask 1041408   ;;  %v1823_v0 = vmov 65535  }
  0x25   : > { %v371_v1 = vsel %vm369_vm0, 4294967295, %v1823_v0  ;;  %v360_v3 = vld [vmem:[#allocation2] sm:$0x3]  ;;  %vm365_vm2 = vcmask 23552   ;;  %v1483_v8 = vld [vmem:[%s2044_s3 + $0x18] sm:$0xff]  ;;  %v1482_v9 = vld [vmem:[%s2044_s3 + $0x10] sm:$0xff] }
  0x26   : > { %s343_s2 = scalar_select %p342_p0, %s1808_s27, 1  ;;  %v372_v2 = vsel %vm370_vm1, %v371_v1, 0  ;;  %437 = vmatpush.bf16.msra.mxu1 %v1483_v8  ;;  %v1481_v10 = vld [vmem:[%s2044_s3 + $0x8] sm:$0xff]  ;;  %v1480_v11 = vld [vmem:[%s2044_s3] sm:$0xff]  ;;  %v1541_v21 = vld [vmem:[#allocation7 + $0x1cc] sm:$0xf] }
  0x27   : > { %v374_v6 = vand.u32 %v372_v2, %v360_v3  ;;  %v1445_v12 = vld [vmem:[#allocation7 + $0x1c0] sm:$0xf]  ;;  %v1540_v14 = vld [vmem:[#allocation7 + $0x1c4] sm:$0xf]  ;;  %v1453_v17 = vld [vmem:[#allocation7 + $0x1c8] sm:$0xf] }
  0x28   : > { %s1479_s28 = sshll.u32 %s343_s2, 4  ;;  %v1544_v13 = vld [vmem:[#allocation7 + $0x1dc] sm:$0xf0]  ;;  %v1447_v16 = vld [vmem:[#allocation7 + $0x1e0] sm:$0xf0]  ;;  %vm429_vm3 = vcmask 523264  }
  0x29   : > { %s349_s15 = scalar_lea.vmem %s2041_s0, %s1479_s28  ;;  %383 = vmatpush.bf16.msra.mxu0 %v374_v6  ;;  %v1446_v15 = vor.u32 %v1544_v13, %v1445_v12  ;;  %v1545_v18 = vld [vmem:[#allocation7 + $0x1e4] sm:$0xf0]  ;;  %v1450_v19 = vor.u32 %v1540_v14, %v1447_v16  ;;  %v1455_v22 = vld [vmem:[#allocation7 + $0x1e8] sm:$0xf0]  ;;  %v1413_v23 = vld [vmem:[#allocation7 + $0x180] sm:$0xf] }
  0x2a   : > { %v357_v4 = vld [vmem:[%s349_s15] sm:$0xff]  ;;  %v358_v5 = vld [vmem:[%s349_s15 + $0x8] sm:$0xff]  ;;  %438 = vmatpush.bf16.msra.mxu1 %v1482_v9  ;;  %v1454_v20 = vor.u32 %v1545_v18, %v1453_v17  ;;  %v1458_v24 = vor.u32 %v1541_v21, %v1455_v22  ;;  %v1533_v32 = vld [vmem:[#allocation7 + $0x18c] sm:$0xf]  ;;  %s338_s2 = sand.u32 1, %s1800_s25   ;;  %s1476_s9 = sshll.u32 %s1808_s27, 3 }
  0x2b   : > { %v359_v7 = vpack.c.bf16 %v358_v5, %v357_v4  ;;  %852 = vmatpush.bf16.msra.mxu2 %v1446_v15  ;;  %v1536_v25 = vld [vmem:[#allocation7 + $0x19c] sm:$0xf0]  ;;  %v1532_v26 = vld [vmem:[#allocation7 + $0x184] sm:$0xf]  ;;  %866 = vmatpush.bf16.msra.mxu3 %v1450_v19  ;;  %v1421_v30 = vld [vmem:[#allocation7 + $0x188] sm:$0xf]  ;;  %s1078_s16 = scalar_lea.hbm %s2048_s7, %s1476_s9 }
  0x2c   : > { %v1415_v27 = vld [vmem:[#allocation7 + $0x1a0] sm:$0xf0]  ;;  %v1414_v28 = vor.u32 %v1536_v25, %v1413_v23  ;;  %v1537_v31 = vld [vmem:[#allocation7 + $0x1a4] sm:$0xf0]  ;;  %v1423_v34 = vld [vmem:[#allocation7 + $0x1a8] sm:$0xf0] }
  0x2d   : > { %1201 = vmatmul.msk.bf16.vlgmr.msra.gmra.mxu0 %vm365_vm2, %v359_v7  ;;  %v1418_v29 = vor.u32 %v1532_v26, %v1415_v27  ;;  %v1422_v33 = vor.u32 %v1537_v31, %v1421_v30  ;;  %v1381_v35 = vld [vmem:[#allocation7 + $0x140] sm:$0xf]  ;;  %v1426_v37 = vor.u32 %v1533_v32, %v1423_v34  ;;  %v1524_v38 = vld [vmem:[#allocation7 + $0x144] sm:$0xf]  ;;  %v1389_v40 = vld [vmem:[#allocation7 + $0x148] sm:$0xf] }
  0x2e   : > { %439 = vmatpush.bf16.msra.mxu1 %v1481_v10  ;;  %880 = vmatpush.bf16.msrb.mxu0 %v1454_v20  ;;  %v1528_v36 = vld [vmem:[#allocation7 + $0x15c] sm:$0xf0]  ;;  %v1383_v39 = vld [vmem:[#allocation7 + $0x160] sm:$0xf0]  ;;  %v1529_v42 = vld [vmem:[#allocation7 + $0x164] sm:$0xf0] }
  0x2f   : > { %853 = vmatpush.bf16.msra.mxu2 %v1414_v28  ;;  %v1382_v41 = vor.u32 %v1528_v36, %v1381_v35  ;;  %v1525_v43 = vld [vmem:[#allocation7 + $0x14c] sm:$0xf]  ;;  %867 = vmatpush.bf16.msra.mxu3 %v1418_v29  ;;  %v1386_v45 = vor.u32 %v1524_v38, %v1383_v39  ;;  %v1390_v46 = vor.u32 %v1529_v42, %v1389_v40  ;;  %v1349_v47 = vld [vmem:[#allocation7 + $0x100] sm:$0xf]  ;;  %v1516_v49 = vld [vmem:[#allocation7 + $0x104] sm:$0xf] }
  0x30   : > { %v1391_v44 = vld [vmem:[#allocation7 + $0x168] sm:$0xf0]  ;;  %v1520_v48 = vld [vmem:[#allocation7 + $0x11c] sm:$0xf0]  ;;  %v1351_v51 = vld [vmem:[#allocation7 + $0x120] sm:$0xf0] }
  0x31   : > { %v1394_v50 = vor.u32 %v1525_v43, %v1391_v44  ;;  %v1357_v52 = vld [vmem:[#allocation7 + $0x108] sm:$0xf]  ;;  %v1517_v54 = vld [vmem:[#allocation7 + $0x10c] sm:$0xf]  ;;  %v1350_v56 = vor.u32 %v1520_v48, %v1349_v47  ;;  %v1354_v57 = vor.u32 %v1516_v49, %v1351_v51  ;;  %v1317_v59 = vld [vmem:[#allocation7 + $0xc0] sm:$0xf] }
  0x32   : > { %440 = vmatpush.bf16.msra.mxu1 %v1480_v11  ;;  %881 = vmatpush.bf16.msrb.mxu0 %v1422_v33  ;;  %v1521_v53 = vld [vmem:[#allocation7 + $0x124] sm:$0xf0]  ;;  %v1359_v55 = vld [vmem:[#allocation7 + $0x128] sm:$0xf0]  ;;  %v1512_v60 = vld [vmem:[#allocation7 + $0xdc] sm:$0xf0] }
  0x33   : > { %854 = vmatpush.bf16.msra.mxu2 %v1382_v41  ;;  %868 = vmatpush.bf16.msra.mxu3 %v1386_v45  ;;  %v1358_v58 = vor.u32 %v1521_v53, %v1357_v52  ;;  %v1508_v61 = vld [vmem:[#allocation7 + $0xc4] sm:$0xf]  ;;  %v1362_v62 = vor.u32 %v1517_v54, %v1359_v55  ;;  %v1325_v0 = vld [vmem:[#allocation7 + $0xc8] sm:$0xf]  ;;  %v1509_v2 = vld [vmem:[#allocation7 + $0xcc] sm:$0xf]  ;;  %v1318_v4 = vor.u32 %v1512_v60, %v1317_v59 }
  0x34   : > { %v1319_v63 = vld [vmem:[#allocation7 + $0xe0] sm:$0xf0]  ;;  %v1513_v1 = vld [vmem:[#allocation7 + $0xe4] sm:$0xf0]  ;;  %v1327_v3 = vld [vmem:[#allocation7 + $0xe8] sm:$0xf0] }
  0x35   : > { %v1322_v5 = vor.u32 %v1508_v61, %v1319_v63  ;;  %v1326_v6 = vor.u32 %v1513_v1, %v1325_v0  ;;  %v1285_v7 = vld [vmem:[#allocation7 + $0x80] sm:$0xf]  ;;  %v1500_v9 = vld [vmem:[#allocation7 + $0x84] sm:$0xf]  ;;  %v1330_v11 = vor.u32 %v1509_v2, %v1327_v3  ;;  %v1293_v13 = vld [vmem:[#allocation7 + $0x88] sm:$0xf] }
  0x36   : > { %894 = vmatpush.bf16.msrb.mxu1 %v1458_v24  ;;  %882 = vmatpush.bf16.msrb.mxu0 %v1390_v46  ;;  %v1504_v8 = vld [vmem:[#allocation7 + $0x9c] sm:$0xf0]  ;;  %v1287_v12 = vld [vmem:[#allocation7 + $0xa0] sm:$0xf0]  ;;  %v1505_v14 = vld [vmem:[#allocation7 + $0xa4] sm:$0xf0] }
  0x37   : > { %855 = vmatpush.bf16.msra.mxu2 %v1350_v56  ;;  %869 = vmatpush.bf16.msra.mxu3 %v1354_v57  ;;  %v1501_v15 = vld [vmem:[#allocation7 + $0x8c] sm:$0xf]  ;;  %v1638_v17 = vld [vmem:[#allocation5] ss:$0 sm:$0xff]  ;;  %v1286_v18 = vor.u32 %v1504_v8, %v1285_v7  ;;  %v1290_v19 = vor.u32 %v1500_v9, %v1287_v12  ;;  %v1294_v20 = vor.u32 %v1505_v14, %v1293_v13  ;;  %v1253_v21 = vld [vmem:[#allocation7 + $0x40] sm:$0xf] }
  0x38   : > { %v1295_v16 = vld [vmem:[#allocation7 + $0xa8] sm:$0xf0]  ;;  %v1496_v22 = vld [vmem:[#allocation7 + $0x5c] sm:$0xf0]  ;;  %v1492_v23 = vld [vmem:[#allocation7 + $0x44] sm:$0xf] }
  0x39   : > { %v1298_v24 = vor.u32 %v1501_v15, %v1295_v16  ;;  %v1255_v25 = vld [vmem:[#allocation7 + $0x60] sm:$0xf0]  ;;  %v1261_v26 = vld [vmem:[#allocation7 + $0x48] sm:$0xf]  ;;  %v1493_v28 = vld [vmem:[#allocation7 + $0x4c] sm:$0xf]  ;;  %v1254_v30 = vor.u32 %v1496_v22, %v1253_v21 }
  0x3a   : > { %895 = vmatpush.bf16.msrb.mxu1 %v1426_v37  ;;  %883 = vmatpush.bf16.msrb.mxu0 %v1358_v58  ;;  %v1497_v27 = vld [vmem:[#allocation7 + $0x64] sm:$0xf0]  ;;  %v1263_v29 = vld [vmem:[#allocation7 + $0x68] sm:$0xf0]  ;;  %v1258_v32 = vor.u32 %v1492_v23, %v1255_v25  ;;  %v1221_v34 = vld [vmem:[#allocation7] sm:$0xf] }
  0x3b   : > { %856 = vmatpush.bf16.msra.mxu2 %v1318_v4  ;;  %870 = vmatpush.bf16.msra.mxu3 %v1322_v5  ;;  %v1262_v33 = vor.u32 %v1497_v27, %v1261_v26  ;;  %v1488_v35 = vld [vmem:[#allocation7 + $0x1c] sm:$0xf0]  ;;  %v1266_v37 = vor.u32 %v1493_v28, %v1263_v29  ;;  %v1484_v38 = vld [vmem:[#allocation7 + $0x4] sm:$0xf]  ;;  %v1229_v40 = vld [vmem:[#allocation7 + $0x8] sm:$0xf] }
  0x3c   : > { %v1223_v39 = vld [vmem:[#allocation7 + $0x20] sm:$0xf0]  ;;  %v1489_v42 = vld [vmem:[#allocation7 + $0x24] sm:$0xf0]  ;;  %v1485_v43 = vld [vmem:[#allocation7 + $0xc] sm:$0xf]  ;;  %v1222_v45 = vor.u32 %v1488_v35, %v1221_v34 }
  0x3d   : > { %v1231_v44 = vld [vmem:[#allocation7 + $0x28] sm:$0xf0]  ;;  %v1226_v48 = vor.u32 %v1484_v38, %v1223_v39  ;;  %v1230_v49 = vor.u32 %v1489_v42, %v1229_v40  ;;  %v1461_v52 = vld [vmem:[#allocation7 + $0x1d0] sm:$0xf]  ;;  %v1542_v54 = vld [vmem:[#allocation7 + $0x1d4] sm:$0xf] }
  0x3e   : > { %896 = vmatpush.bf16.msrb.mxu1 %v1394_v50  ;;  %884 = vmatpush.bf16.msrb.mxu0 %v1326_v6  ;;  %v1234_v50 = vor.u32 %v1485_v43, %v1231_v44  ;;  %v1546_v53 = vld [vmem:[#allocation7 + $0x1ec] sm:$0xf0]  ;;  %v1463_v56 = vld [vmem:[#allocation7 + $0x1f0] sm:$0xf0]  ;;  %v1469_v57 = vld [vmem:[#allocation7 + $0x1d8] sm:$0xf] }
  0x3f   : > { %857 = vmatpush.bf16.msra.mxu2 %v1286_v18  ;;  %871 = vmatpush.bf16.msra.mxu3 %v1290_v19  ;;  %v1462_v55 = vor.u32 %v1546_v53, %v1461_v52  ;;  %v1547_v58 = vld [vmem:[#allocation7 + $0x1f4] sm:$0xf0]  ;;  %v1466_v59 = vor.u32 %v1542_v54, %v1463_v56  ;;  %v1543_v61 = vld [vmem:[#allocation7 + $0x1dc] sm:$0xf]  ;;  %v1429_v0 = vld [vmem:[#allocation7 + $0x190] sm:$0xf] }
  0x40   : > { %v1470_v60 = vor.u32 %v1547_v58, %v1469_v57  ;;  %v1538_v1 = vld [vmem:[#allocation7 + $0x1ac] sm:$0xf0]  ;;  %v1534_v2 = vld [vmem:[#allocation7 + $0x194] sm:$0xf]  ;;  %v1437_v5 = vld [vmem:[#allocation7 + $0x198] sm:$0xf] }
  0x41   : > { %v1430_v3 = vor.u32 %v1538_v1, %v1429_v0  ;;  %v1431_v4 = vld [vmem:[#allocation7 + $0x1b0] sm:$0xf0]  ;;  %v1539_v6 = vld [vmem:[#allocation7 + $0x1b4] sm:$0xf0]  ;;  %v1535_v9 = vld [vmem:[#allocation7 + $0x19c] sm:$0xf] }
  0x42   : > { %897 = vmatpush.bf16.msrb.mxu1 %v1362_v62  ;;  %885 = vmatpush.bf16.msrb.mxu0 %v1294_v20  ;;  %v1471_v62 = vld [vmem:[#allocation7 + $0x1f8] sm:$0xf0]  ;;  %v1434_v7 = vor.u32 %v1534_v2, %v1431_v4  ;;  %v1438_v8 = vor.u32 %v1539_v6, %v1437_v5  ;;  %v1397_v12 = vld [vmem:[#allocation7 + $0x150] sm:$0xf]  ;;  %v1526_v14 = vld [vmem:[#allocation7 + $0x154] sm:$0xf] }
  0x43   : > { %858 = vmatpush.bf16.msra.mxu2 %v1254_v30  ;;  %872 = vmatpush.bf16.msra.mxu3 %v1258_v32  ;;  %v1474_v63 = vor.u32 %v1543_v61, %v1471_v62  ;;  %v1530_v13 = vld [vmem:[#allocation7 + $0x16c] sm:$0xf0]  ;;  %v1399_v16 = vld [vmem:[#allocation7 + $0x170] sm:$0xf0]  ;;  %v1531_v18 = vld [vmem:[#allocation7 + $0x174] sm:$0xf0] }
  0x44   : > { %v1398_v15 = vor.u32 %v1530_v13, %v1397_v12  ;;  %v1402_v19 = vor.u32 %v1526_v14, %v1399_v16  ;;  %v1527_v21 = vld [vmem:[#allocation7 + $0x15c] sm:$0xf]  ;;  %v1522_v25 = vld [vmem:[#allocation7 + $0x12c] sm:$0xf0]  ;;  %v1518_v26 = vld [vmem:[#allocation7 + $0x114] sm:$0xf] }
  0x45   : > { %v1407_v22 = vld [vmem:[#allocation7 + $0x178] sm:$0xf0]  ;;  %v1367_v28 = vld [vmem:[#allocation7 + $0x130] sm:$0xf0]  ;;  %v1373_v29 = vld [vmem:[#allocation7 + $0x118] sm:$0xf] }
  0x46   : > { %898 = vmatpush.bf16.msrb.mxu1 %v1330_v11  ;;  %886 = vmatpush.bf16.msrb.mxu0 %v1262_v33  ;;  %v1410_v23 = vor.u32 %v1527_v21, %v1407_v22  ;;  %v1523_v30 = vld [vmem:[#allocation7 + $0x134] sm:$0xf0]  ;;  %v1519_v33 = vld [vmem:[#allocation7 + $0x11c] sm:$0xf]  ;;  %v1510_v38 = vld [vmem:[#allocation7 + $0xd4] sm:$0xf] }
  0x47   : > { %859 = vmatpush.bf16.msra.mxu2 %v1222_v45  ;;  %873 = vmatpush.bf16.msra.mxu3 %v1226_v48  ;;  %v1374_v32 = vor.u32 %v1523_v30, %v1373_v29  ;;  %v1375_v34 = vld [vmem:[#allocation7 + $0x138] sm:$0xf0]  ;;  %v1335_v40 = vld [vmem:[#allocation7 + $0xf0] sm:$0xf0]  ;;  %v1515_v42 = vld [vmem:[#allocation7 + $0xf4] sm:$0xf0] }
  0x48   : > { %v1378_v35 = vor.u32 %v1519_v33, %v1375_v34  ;;  %v1338_v43 = vor.u32 %v1510_v38, %v1335_v40  ;;  %v1511_v45 = vld [vmem:[#allocation7 + $0xdc] sm:$0xf]  ;;  %v1309_v54 = vld [vmem:[#allocation7 + $0x98] sm:$0xf]  ;;  %v1494_v62 = vld [vmem:[#allocation7 + $0x54] sm:$0xf] }
  0x49   : > { %v1503_v56 = vld [vmem:[#allocation7 + $0x9c] sm:$0xf]  ;;  %v1277_v0 = vld [vmem:[#allocation7 + $0x58] sm:$0xf]  ;;  %s1998_s28 = sshll.u32 %s338_s2, 3  ;;  %vm1053_vm4 = vcmask 1042434  }
  0x4a   : > { %899 = vmatpush.bf16.msrb.mxu1 %v1298_v24  ;;  %887 = vmatpush.bf16.msrb.mxu0 %v1230_v49  ;;  %v1365_v24 = vld [vmem:[#allocation7 + $0x110] sm:$0xf]  ;;  %v1311_v58 = vld [vmem:[#allocation7 + $0xb8] sm:$0xf0]  ;;  %v1499_v2 = vld [vmem:[#allocation7 + $0x74] sm:$0xf0] }
  0x4b   : > { %908 = vmatpush.bf16.msrb.mxu2 %v1462_v55  ;;  %922 = vmatpush.bf16.msrb.mxu3 %v1466_v59  ;;  %v1366_v27 = vor.u32 %v1522_v25, %v1365_v24  ;;  %v1506_v49 = vld [vmem:[#allocation7 + $0xac] sm:$0xf0]  ;;  %v1507_v55 = vld [vmem:[#allocation7 + $0xb4] sm:$0xf0]  ;;  %v1314_v61 = vor.u32 %v1503_v56, %v1311_v58  ;;  %v1279_v4 = vld [vmem:[#allocation7 + $0x78] sm:$0xf0]  ;;  %v1278_v6 = vor.u32 %v1499_v2, %v1277_v0 }
  0x4c   : > { %v1310_v57 = vor.u32 %v1507_v55, %v1309_v54  ;;  %v1269_v59 = vld [vmem:[#allocation7 + $0x50] sm:$0xf]  ;;  %v1245_v12 = vld [vmem:[#allocation7 + $0x18] sm:$0xf]  ;;  %v1487_v14 = vld [vmem:[#allocation7 + $0x1c] sm:$0xf] }
  0x4d   : > { %v1491_v13 = vld [vmem:[#allocation7 + $0x34] sm:$0xf0]  ;;  %v1639_v21 = vld [vmem:[%s2045_s4] ss:$0 sm:$0xff]  ;;  %vm1058_vm5 = vcmask 1046534   ;;  %vm1056_vm6 = vcmask 1044484  }
  0x4e   : > { %900 = vmatpush.bf16.msrb.mxu1 %v1266_v37  ;;  %936 = vmatpush.bf16.msra.mxu0 %v1470_v60  ;;  %v1514_v37 = vld [vmem:[#allocation7 + $0xec] sm:$0xf0]  ;;  %v1985_v30 = vld [vmem:[%s2047_s6] sm:$0xff]  ;;  %vm1060_vm7 = vcmask 1045508   ;;  %vm1062_vm8 = vcmask 1043456   ;;  %s340_s27 = scalar_lea.vmem [#allocation8], %s1998_s28 }
  0x4f   : > { %909 = vmatpush.bf16.msrb.mxu2 %v1430_v3  ;;  %923 = vmatpush.bf16.msrb.mxu3 %v1434_v7  ;;  %v1498_v60 = vld [vmem:[#allocation7 + $0x6c] sm:$0xf0]  ;;  %v1495_v3 = vld [vmem:[#allocation7 + $0x5c] sm:$0xf]  ;;  %v519_v34 = vperm.slane %v1985_v30, 3  ;;  %v523_v0 = vperm.slane %v1985_v30, 7 }
  0x50   : > { %v1270_v1 = vor.u32 %v1498_v60, %v1269_v59  ;;  %v1237_v7 = vld [vmem:[#allocation7 + $0x10] sm:$0xf]  ;;  %s1080_s19 = sshll.u32 %s340_s27, 4  ;;  %s1082_s21 = sshll.u32 %s1078_s16, 4  ;;  %s1081_s19 = int_to_ptr.vmem [resolvable:$true] %s1080_s19  ;;  %s1083_s21 = int_to_ptr.hbm [resolvable:$true] %s1082_s21 }
  0x51   : > { %s1068_s22 = scalar_lea.sflag [#allocation4], %s338_s2  ;;  %s1744_s23 = sshra.s32 %s1083_s21, 4  ;;  %s1745_s23 = int_to_ptr.hbm [resolvable:$true] %s1744_s23 }
  0x52   : > { %901 = vmatpush.bf16.msrb.mxu1 %v1234_v50  ;;  %937 = vmatpush.bf16.msra.mxu0 %v1438_v8  ;;  %v1502_v50 = vld [vmem:[#allocation7 + $0x94] sm:$0xf]  ;;  %v1490_v8 = vld [vmem:[#allocation7 + $0x2c] sm:$0xf0]  ;;  %s1746_s30 = scalar_lea.hbm %s1745_s23, 8  ;;  %s1750_s12 = scalar_lea.hbm %s2048_s7, 16 }
  0x53   : > { %910 = vmatpush.bf16.msrb.mxu2 %v1398_v15  ;;  %924 = vmatpush.bf16.msrb.mxu3 %v1402_v19  ;;  %v1247_v15 = vld [vmem:[#allocation7 + $0x38] sm:$0xf0]  ;;  %v1238_v16 = vor.u32 %v1490_v8, %v1237_v7  ;;  %p1747_p1 = scmp.ne.s32.totalorder %s1745_s23, %s1746_s30  ;;  %p1751_p5 = scmp.lt.s32.totalorder %s1745_s23, %s2048_s7 }
  0x54   : > { %v1250_v19 = vor.u32 %v1487_v14, %v1247_v15  ;;  %p1752_p6 = scmp.lt.s32.totalorder %s1750_s12, %s1746_s30 }
  0x55   : > { %p1748_p2 = pnand %p1747_p1, %p1904_p4 }
  0x56   : > { %p1753_p7 = por %p1752_p6, %p1751_p5 }
  0x57   : > { %911 = vmatpush.bf16.msrb.mxu2 %v1366_v27  ;;  %p1749_p3 = pneg %p1748_p2 }
  0x59   : > { %p1754_p9 = pnand %p1753_p7, %p1749_p3 }
  0xaa   : > { %v385_v10 = vpop.f32.mrf.mxu0 }
  0xab   : > { %v386_v31 = vadd.f32 %v1638_v17, %v385_v10  ;;  %v1439_v10 = vld [vmem:[#allocation7 + $0x1b8] sm:$0xf0] }
  0xac   : > { %v1442_v11 = vor.u32 %v1535_v9, %v1439_v10  ;;  %v1486_v9 = vld [vmem:[#allocation7 + $0x14] sm:$0xf]  ;;  %v1282_v10 = vor.u32 %v1495_v3, %v1279_v4 }
  0xad   : > { %v390_v46 = vmax.f32 %v386_v31, 0.0  ;;  %v1370_v31 = vor.u32 %v1518_v26, %v1367_v28 }
  0xaf   : > { %925 = vmatpush.bf16.msrb.mxu3 %v1370_v31  ;;  %v518_v31 = vperm.slane %v1985_v30, 2 }
  0xb2   : > { %v387_v36 = vpop.f32.mrf.mxu0 }
  0xb3   : > { %v388_v41 = vadd.f32 %v1638_v17, %v387_v36  ;;  %v1405_v17 = vld [vmem:[#allocation7 + $0x158] sm:$0xf]  ;;  %v1333_v36 = vld [vmem:[#allocation7 + $0xd0] sm:$0xf]  ;;  %926 = vmatpush.bf16.msrb.mxu3 %v1338_v43 }
  0xb4   : > { %v1406_v20 = vor.u32 %v1531_v18, %v1405_v17  ;;  %v1334_v39 = vor.u32 %v1514_v37, %v1333_v36  ;;  %v1246_v18 = vor.u32 %v1491_v13, %v1245_v12  ;;  %v517_v36 = vperm.slane %v1985_v30, 1 }
  0xb5   : > { %v391_v47 = vmax.f32 %v388_v41, 0.0  ;;  %v1341_v41 = vld [vmem:[#allocation7 + $0xd8] sm:$0xf] }
  0xb6   : > { %938 = vmatpush.bf16.msra.mxu0 %v1406_v20  ;;  %v1342_v44 = vor.u32 %v1515_v42, %v1341_v41  ;;  %912 = vmatpush.bf16.msrb.mxu2 %v1334_v39  ;;  %v516_v42 = vperm.slane %v1985_v30, 0 }
  0xb7   : > { %v392_v51 = vpack.c.bf16 %v391_v47, %v390_v46  ;;  %v1343_v46 = vld [vmem:[#allocation7 + $0xf8] sm:$0xf0]  ;;  %v1301_v47 = vld [vmem:[#allocation7 + $0x90] sm:$0xf] }
  0xb8   : > { %v1346_v48 = vor.u32 %v1511_v45, %v1343_v46  ;;  %v1302_v52 = vor.u32 %v1506_v49, %v1301_v47 }
  0xb9   : > { %1218 = vmatmul.msk.bf16.vlgmr.msra.gmra.mxu1 %vm429_vm3, %v392_v51  ;;  %v1303_v51 = vld [vmem:[#allocation7 + $0xb0] sm:$0xf0] }
  0xba   : > { %950 = vmatpush.bf16.msra.mxu1 %v1474_v63  ;;  %939 = vmatpush.bf16.msra.mxu0 %v1374_v32  ;;  %v1306_v53 = vor.u32 %v1502_v50, %v1303_v51  ;;  %v1271_v63 = vld [vmem:[#allocation7 + $0x70] sm:$0xf0] }
  0xbb   : > { %913 = vmatpush.bf16.msrb.mxu2 %v1302_v52  ;;  %v1274_v5 = vor.u32 %v1494_v62, %v1271_v63  ;;  %v522_v62 = vperm.slane %v1985_v30, 6 }
  0xbc   : > { %927 = vmatpush.bf16.msrb.mxu3 %v1306_v53 }
  0xbe   : > { %951 = vmatpush.bf16.msra.mxu1 %v1442_v11  ;;  %940 = vmatpush.bf16.msra.mxu0 %v1342_v44  ;;  %v1239_v11 = vld [vmem:[#allocation7 + $0x30] sm:$0xf0] }
  0xbf   : > { %914 = vmatpush.bf16.msrb.mxu2 %v1270_v1  ;;  %v1242_v17 = vor.u32 %v1486_v9, %v1239_v11  ;;  %v520_v9 = vperm.slane %v1985_v30, 4  ;;  %v521_v11 = vperm.slane %v1985_v30, 5 }
  0xc0   : > { %928 = vmatpush.bf16.msrb.mxu3 %v1274_v5 }
  0xc2   : > { %952 = vmatpush.bf16.msra.mxu1 %v1410_v23  ;;  %941 = vmatpush.bf16.msra.mxu0 %v1310_v57 }
  0xc3   : > { %915 = vmatpush.bf16.msrb.mxu2 %v1238_v16 }
  0xc4   : > { %929 = vmatpush.bf16.msrb.mxu3 %v1242_v17 }
  0xc6   : > { %953 = vmatpush.bf16.msra.mxu1 %v1378_v35  ;;  %942 = vmatpush.bf16.msra.mxu0 %v1278_v6 }
  0xca   : > { %954 = vmatpush.bf16.msra.mxu1 %v1346_v48  ;;  %943 = vmatpush.bf16.msra.mxu0 %v1246_v18 }
  0xce   : > { %955 = vmatpush.bf16.msra.mxu1 %v1314_v61 }
  0xd2   : > { %956 = vmatpush.bf16.msra.mxu1 %v1282_v10 }
  0xd6   : > { %957 = vmatpush.bf16.msra.mxu1 %v1250_v19 }
 0x136   : > { %v442_v20 = vpop.f32.mrf.mxu1 }
 0x137   : > { %v443_v22 = vadd.f32 %v1639_v21, %v442_v20 }
 0x139   : > { %v447_v25 = vmax.f32 %v443_v22, 0.0 }
 0x13e   : > { %v444_v23 = vpop.f32.mrf.mxu1 }
 0x13f   : > { %v445_v24 = vadd.f32 %v1639_v21, %v444_v23 }
 0x141   : > { %v448_v26 = vmax.f32 %v445_v24, 0.0 }
 0x143   : > { %v449_v27 = vpack.c.bf16 %v448_v26, %v447_v25 }
 0x145   : > { %860 = vmatmul.bf16.vlgmr.msra.gmra.mxu2 %v449_v27  ;;  %874 = vmatmul.bf16.vlgmr.msra.gmra.mxu3 %v449_v27 }
 0x146   : > { %888 = vmatmul.bf16.vlgmr.msrb.gmra.mxu0 %v449_v27  ;;  %902 = vmatmul.bf16.vlgmr.msrb.gmra.mxu1 %v449_v27 }
 0x155   : > { %916 = vmatmul.bf16.vlgmr.msrb.gmra.mxu2 %v449_v27  ;;  %930 = vmatmul.bf16.vlgmr.msrb.gmra.mxu3 %v449_v27 }
 0x156   : > { %944 = vmatmul.bf16.vlgmr.msra.gmra.mxu0 %v449_v27  ;;  %958 = vmatmul.bf16.vlgmr.msra.gmra.mxu1 %v449_v27 }
 0x1c3   : > { %v889_v28 = vpop.f32.mrf.mxu0  ;;  %v903_v29 = vpop.f32.mrf.mxu1 }
 0x1c4   : > { %v890_v35 = vadd.f32 %v889_v28, %v518_v31  ;;  %v904_v41 = vadd.f32 %v903_v29, %v519_v34 }
 0x1c6   : > { %v966_v44 = vmax.f32 %v890_v35, 0.0  ;;  %v967_v52 = vmax.f32 %v904_v41, 0.0 }
 0x1c8   : > { %v861_v32 = vpop.f32.mrf.mxu2  ;;  %v875_v33 = vpop.f32.mrf.mxu3 }
 0x1c9   : > { %v876_v45 = vadd.f32 %v875_v33, %v517_v36  ;;  %v862_v53 = vadd.f32 %v861_v32, %v516_v42 }
 0x1cb   : > { %v891_v37 = vpop.f32.mrf.mxu0  ;;  %v905_v38 = vpop.f32.mrf.mxu1  ;;  %v965_v54 = vmax.f32 %v876_v45, 0.0  ;;  %v964_v63 = vmax.f32 %v862_v53, 0.0 }
 0x1cc   : > { %v892_v39 = vadd.f32 %v891_v37, %v518_v31  ;;  %v906_v40 = vadd.f32 %v905_v38, %v519_v34 }
 0x1ce   : > { %v974_v43 = vmax.f32 %v892_v39, 0.0  ;;  %v975_v46 = vmax.f32 %v906_v40, 0.0 }
 0x1d0   : > { %v863_v47 = vpop.f32.mrf.mxu2  ;;  %v877_v48 = vpop.f32.mrf.mxu3  ;;  %v995_v49 = vmax.f32 %v966_v44, %v974_v43  ;;  %v1002_v58 = vmax.f32 %v967_v52, %v975_v46 }
 0x1d1   : > { %v864_v50 = vadd.f32 %v863_v47, %v516_v42  ;;  %v878_v51 = vadd.f32 %v877_v48, %v517_v36 }
 0x1d2   : > { %v996_v60 = vrot.slane %v995_v49, 4  ;;  %v1003_v2 = vrot.slane %v1002_v58, 4 }
 0x1d3   : > { %v973_v55 = vmax.f32 %v878_v51, 0.0  ;;  %v945_v56 = vpop.f32.mrf.mxu0  ;;  %v959_v57 = vpop.f32.mrf.mxu1  ;;  %v972_v59 = vmax.f32 %v864_v50, 0.0 }
 0x1d4   : > { %v997_v6 = vmax.f32 %v995_v49, %v996_v60  ;;  %v946_v7 = vadd.f32 %v945_v56, %v522_v62  ;;  %v960_v8 = vadd.f32 %v959_v57, %v523_v0  ;;  %v1004_v14 = vmax.f32 %v1002_v58, %v1003_v2 }
 0x1d5   : > { %v988_v61 = vmax.f32 %v965_v54, %v973_v55  ;;  %v981_v3 = vmax.f32 %v964_v63, %v972_v59 }
 0x1d6   : > { %v998_v18 = vrot.slane %v997_v6, 2  ;;  %v970_v19 = vmax.f32 %v946_v7, 0.0  ;;  %v971_v20 = vmax.f32 %v960_v8, 0.0  ;;  %v1005_v26 = vrot.slane %v1004_v14, 2 }
 0x1d7   : > { %v989_v1 = vrot.slane %v988_v61, 4  ;;  %v982_v15 = vrot.slane %v981_v3, 4 }
 0x1d8   : > { %v917_v4 = vpop.f32.mrf.mxu2  ;;  %v931_v5 = vpop.f32.mrf.mxu3  ;;  %v999_v34 = vmax.f32 %v997_v6, %v998_v18  ;;  %v1006_v42 = vmax.f32 %v1004_v14, %v1005_v26 }
 0x1d9   : > { %v990_v10 = vmax.f32 %v988_v61, %v989_v1  ;;  %v918_v21 = vadd.f32 %v917_v4, %v520_v9  ;;  %v932_v25 = vadd.f32 %v931_v5, %v521_v11  ;;  %v983_v27 = vmax.f32 %v981_v3, %v982_v15 }
 0x1da   : > { %v1000_v50 = vrot.slane %v999_v34, 1  ;;  %v1007_v54 = vrot.slane %v1006_v42, 1 }
 0x1db   : > { %v947_v12 = vpop.f32.mrf.mxu0  ;;  %v961_v13 = vpop.f32.mrf.mxu1  ;;  %v991_v24 = vrot.slane %v990_v10, 2  ;;  %v968_v35 = vmax.f32 %v918_v21, 0.0  ;;  %v969_v39 = vmax.f32 %v932_v25, 0.0  ;;  %v984_v43 = vrot.slane %v983_v27, 2 }
 0x1dc   : > { %v948_v16 = vadd.f32 %v947_v12, %v522_v62  ;;  %v962_v17 = vadd.f32 %v961_v13, %v523_v0  ;;  %v1001_v1 = vmax.f32 %v999_v34, %v1000_v50  ;;  %v1008_v2 = vmax.f32 %v1006_v42, %v1007_v54 }
 0x1dd   : > { %v992_v38 = vmax.f32 %v990_v10, %v991_v24  ;;  %v985_v55 = vmax.f32 %v983_v27, %v984_v43 }
 0x1de   : > { %v978_v22 = vmax.f32 %v948_v16, 0.0  ;;  %v979_v23 = vmax.f32 %v962_v17, 0.0  ;;  %v1047_v12 = vrot.slane %v1008_v2, 5 }
 0x1df   : > { %v993_v51 = vrot.slane %v992_v38, 1  ;;  %v986_v3 = vrot.slane %v985_v55, 1 }
 0x1e0   : > { %v1023_v28 = vmax.f32 %v970_v19, %v978_v22  ;;  %v1030_v29 = vmax.f32 %v971_v20, %v979_v23  ;;  %v919_v31 = vpop.f32.mrf.mxu2  ;;  %v933_v30 = vpop.f32.mrf.mxu3 }
 0x1e1   : > { %v920_v32 = vadd.f32 %v919_v31, %v520_v9  ;;  %v934_v33 = vadd.f32 %v933_v30, %v521_v11  ;;  %v994_v62 = vmax.f32 %v992_v38, %v993_v51  ;;  %v1046_v11 = vrot.slane %v1001_v1, 6 }
 0x1e2   : > { %v1024_v36 = vrot.slane %v1023_v28, 4  ;;  %v1031_v37 = vrot.slane %v1030_v29, 4  ;;  %v987_v13 = vmax.f32 %v985_v55, %v986_v3 }
 0x1e3   : > { %v976_v40 = vmax.f32 %v920_v32, 0.0  ;;  %v977_v41 = vmax.f32 %v934_v33, 0.0  ;;  %v1045_v8 = vrot.slane %v994_v62, 7  ;;  %v1054_v21 = vsel %vm1053_vm4, %v1046_v11, %v1047_v12 }
 0x1e4   : > { %v1025_v44 = vmax.f32 %v1023_v28, %v1024_v36  ;;  %v1032_v45 = vmax.f32 %v1030_v29, %v1031_v37 }
 0x1e5   : > { %v1009_v46 = vmax.f32 %v968_v35, %v976_v40  ;;  %v1016_v47 = vmax.f32 %v969_v39, %v977_v41  ;;  %v1052_v18 = vsel %vm369_vm0, %v987_v13, %v1045_v8 }
 0x1e6   : > { %v1026_v48 = vrot.slane %v1025_v44, 2  ;;  %v1033_v49 = vrot.slane %v1032_v45, 2  ;;  %v1055_v24 = vsel %vm370_vm1, %v1052_v18, %v1054_v21 }
 0x1e7   : > { %v1010_v52 = vrot.slane %v1009_v46, 4  ;;  %v1017_v53 = vrot.slane %v1016_v47, 4 }
 0x1e8   : > { %v1027_v56 = vmax.f32 %v1025_v44, %v1026_v48  ;;  %v1034_v57 = vmax.f32 %v1032_v45, %v1033_v49 }
 0x1e9   : > { %v1011_v58 = vmax.f32 %v1009_v46, %v1010_v52  ;;  %v1018_v59 = vmax.f32 %v1016_v47, %v1017_v53 }
 0x1ea   : > { %v1028_v60 = vrot.slane %v1027_v56, 1  ;;  %v1035_v61 = vrot.slane %v1034_v57, 1 }
 0x1eb   : > { %v1012_v63 = vrot.slane %v1011_v58, 2  ;;  %v1019_v0 = vrot.slane %v1018_v59, 2 }
 0x1ec   : > { %v1029_v4 = vmax.f32 %v1027_v56, %v1028_v60  ;;  %v1036_v5 = vmax.f32 %v1034_v57, %v1035_v61 }
 0x1ed   : > { %v1013_v6 = vmax.f32 %v1011_v58, %v1012_v63  ;;  %v1020_v7 = vmax.f32 %v1018_v59, %v1019_v0 }
 0x1ee   : > { %v1050_v14 = vrot.slane %v1029_v4, 2  ;;  %v1051_v15 = vrot.slane %v1036_v5, 1 }
 0x1ef   : > { %v1014_v9 = vrot.slane %v1013_v6, 1  ;;  %v1021_v10 = vrot.slane %v1020_v7, 1 }
 0x1f0   : > { %v1059_v22 = vsel %vm1058_vm5, %v1050_v14, %v1051_v15 }
 0x1f1   : > { %v1015_v16 = vmax.f32 %v1013_v6, %v1014_v9  ;;  %v1022_v17 = vmax.f32 %v1020_v7, %v1021_v10 }
 0x1f3   : > { %v1048_v19 = vrot.slane %v1015_v16, 4  ;;  %v1049_v20 = vrot.slane %v1022_v17, 3 }
 0x1f5   : > { %v1057_v23 = vsel %vm1056_vm6, %v1048_v19, %v1049_v20 }
 0x1f6   : > { %v1061_v25 = vsel %vm1060_vm7, %v1057_v23, %v1059_v22 }
 0x1f7   : > { %v1063_v26 = vsel %vm1062_vm8, %v1055_v24, %v1061_v25 }
 0x1f8   : > { %1066 = vst [vmem:[%s340_s27] sm:$0xff] %v1063_v26 }
 0x1f9   : > { %1757 = shalt.err (!%p1754_p9)
}
 0x1fa   : > { %1560 = dma.vmem_to_hbm [thread:$0]  (%p1904_p4), %s1081_s19, 128, %s1083_s21, %s1068_s22  }
 0x1fb PF: > { %p1582_p10 = scmp.ge.s32.totalorder %s1816_s29, 2  ;;  %s1094_s20 = sand.u32 1, %s1796_s24  }
 0x1fc   : > { %s1095_s2 = scalar_lea.sflag [#allocation4], %s1094_s20 }
 0x1fd   : > { %p1573_p11 = pnand %p1582_p10, %p1911_p8 }
 0x1ff   : > { %p1574_p12 = pneg %p1573_p11 }
 0x201   : > { %1791 = dma.done.wait (%p1574_p12), %s1095_s2, 128  }
 0x202   : > { %1793 = vsyncadd (%p1574_p12), %s1095_s2, 4294967168  ;;  %s22_s29 = sadd.s32 1, %s1816_s29   ;;  %s2061_s28 = sld [smem:[#allocation14_spill]] }
 0x203   : > { %p19_p13 = scmp.ge.s32.totalorder %s22_s29, 4   ;;  %s2062_s27 = sld [smem:[#allocation12_spill]] }
 0x204   : > { %s2063_s11 = sld [smem:[#allocation13_spill]]  ;;  %s2064_s24 = smov %s1800_s25 }
 0x205   : > { %s2065_s25 = smov %s1804_s26 }
 0x206   :  { %21 = sbr.rel (!%p19_p13) target bundleno = 8 (0x8), region = 100 }
 0x208   : > { %s2066_s26 = smov %s2061_s28 }
 0x20a   : > { %s2067_s28 = smov %s2063_s11 }
 0x20b   :  { %1101 = vsyncpa [#allocation3], 1 }
 0x20c   :  { %1103 = vsyncpa [#allocation3 + $0x1], 1 }
 0x20d   :  { %1104 = vsyncpa [#allocation6], 1 }
 0x20e   :  { %1105 = vsyncpa [#allocation4], 1 }
 0x20f   :  { %1107 = vsyncpa [#allocation4 + $0x1], 1 }

</bundles_post_ra>
